<compile_context>
chip_gen: v5e
topology: v5e:2x2
jax: 0.10.0
libtpu: 0.0.40
codegen_flags: <defaults>
</compile_context>

<pallas_src>
import jax
import jax.numpy as jnp
import numpy as np
from jax.experimental import pallas as pl
from jax.experimental.pallas import tpu as pltpu

_LANE = 128
_SUBLANE = 8


def _round_up(x, m):
    return ((x + m - 1) // m) * m


def strategy_net_kernel(x_ref, act_ref,
                        w1_ref, b1_ref,
                        w2_ref, b2_ref,
                        w3s_ref, w3a_ref, b3_ref,
                        w4_ref, b4_ref,
                        o_ref):
    # state branch: tanh(x @ W1 + b1)
    h = jnp.tanh(
        jnp.dot(x_ref[...], w1_ref[...], preferred_element_type=jnp.float32)
        + b1_ref[...])
    # action branch: tanh(action @ W2 + b2)
    a = jnp.tanh(
        jnp.dot(act_ref[...], w2_ref[...], preferred_element_type=jnp.float32)
        + b2_ref[...])
    # hidden layer on concat([h, a]) == h @ W3[:H] + a @ W3[H:] + b3
    # (two MXU accumulations; no lane-axis concat / XLU copy)
    z = jnp.tanh(
        jnp.dot(h, w3s_ref[...], preferred_element_type=jnp.float32)
        + jnp.dot(a, w3a_ref[...], preferred_element_type=jnp.float32)
        + b3_ref[...])
    # output layer + abs (output columns are 128-padded -> lane-dense store)
    o_ref[...] = jnp.abs(
        jnp.dot(z, w4_ref[...], preferred_element_type=jnp.float32)
        + b4_ref[...])


def strategy_net_forward(x, action, params, *, tile_b=512):
    """x: (B, input_dim), action: (B, input_dim_2). Returns (B, output_dim) f32."""
    (w1, b1, w2, b2, w3s, w3a, b3, w4, b4) = params
    B = x.shape[0]
    in_dim = x.shape[1]
    in_dim_2 = action.shape[1]
    hidden = w1.shape[1]
    hidden_2 = w2.shape[1]
    out_dim = w4.shape[1]

    # ---- lane-dense output: zero-pad out-projection to 128 columns ----------
    out_pad = _round_up(out_dim, _LANE)
    if out_pad != out_dim:
        w4p = jnp.zeros((w4.shape[0], out_pad), w4.dtype).at[:, :out_dim].set(w4)
        b4p = jnp.zeros((1, out_pad), b4.dtype).at[:, :out_dim].set(b4)
    else:
        w4p, b4p = w4, b4

    # ---- batch tile: big (amortize per-step overhead), multiple of 8 --------
    B8 = _round_up(B, _SUBLANE)
    tb = max(_SUBLANE, min(_round_up(tile_b, _SUBLANE), B8))
    # keep >= 2 parallel grid steps when the batch allows (v7x has 2 TCs)
    if (B8 + tb - 1) // tb < 2 and B8 >= 2 * _SUBLANE:
        tb = _round_up((B8 + 1) // 2, _SUBLANE)

    Bp = _round_up(B, tb)
    if Bp != B:
        x = jnp.pad(x, ((0, Bp - B), (0, 0)))
        action = jnp.pad(action, ((0, Bp - B), (0, 0)))

    grid = (Bp // tb,)

    def batch_spec(feat):
        return pl.BlockSpec((tb, feat), lambda i: (i, 0))

    def full_spec(arr):
        return pl.BlockSpec(arr.shape, lambda i: (0, 0))

    # ---- advisory cost estimate ---------------------------------------------
    flops = 2 * Bp * (in_dim * hidden
                      + in_dim_2 * hidden_2
                      + (hidden + hidden_2) * hidden
                      + hidden * out_pad)
    transcendentals = Bp * (hidden + hidden_2 + hidden)          # tanh count
    weight_bytes = 4 * (w1.size + b1.size + w2.size + b2.size
                        + w3s.size + w3a.size + b3.size + w4p.size + b4p.size)
    bytes_accessed = 4 * Bp * (in_dim + in_dim_2 + out_pad) + weight_bytes

    out = pl.pallas_call(
        strategy_net_kernel,
        out_shape=jax.ShapeDtypeStruct((Bp, out_pad), jnp.float32),
        grid_spec=pltpu.PrefetchScalarGridSpec(
            num_scalar_prefetch=0,
            grid=grid,
            in_specs=[
                batch_spec(in_dim),        # x
                batch_spec(in_dim_2),      # action
                full_spec(w1), full_spec(b1),
                full_spec(w2), full_spec(b2),
                full_spec(w3s), full_spec(w3a), full_spec(b3),
                full_spec(w4p), full_spec(b4p),
            ],
            out_specs=batch_spec(out_pad),
        ),
        compiler_params=pltpu.CompilerParams(
            dimension_semantics=("parallel",)),
        cost_estimate=pl.CostEstimate(
            flops=int(flops),
            transcendentals=int(transcendentals),
            bytes_accessed=int(bytes_accessed)),
    )(x, action, w1, b1, w2, b2, w3s, w3a, b3, w4p, b4p)

    # slice off batch padding and the zero-padded output columns
    return out[:B, :out_dim]


def init_params(key, input_dim, input_dim_2, hidden_dim, hidden_dim_2, output_dim):
    """Deterministic synthetic params. Weights stored (in, out); biases (1, out)."""
    ks = jax.random.split(key, 8)

    def lin(kw, kb, fan_in, fan_out):
        bound = 1.0 / np.sqrt(fan_in)
        w = jax.random.uniform(kw, (fan_in, fan_out), jnp.float32, -bound, bound)
        b = jax.random.uniform(kb, (1, fan_out), jnp.float32, -bound, bound)
        return w, b

    w1, b1 = lin(ks[0], ks[1], input_dim, hidden_dim)                  # state_linear
    w2, b2 = lin(ks[2], ks[3], input_dim_2, hidden_dim_2)              # action_linear
    w3, b3 = lin(ks[4], ks[5], hidden_dim + hidden_dim_2, hidden_dim)  # linear_hidden
    w4, b4 = lin(ks[6], ks[7], hidden_dim, output_dim)                 # out
    # split hidden-layer weight into state-half / action-half (replaces concat)
    w3s, w3a = w3[:hidden_dim, :], w3[hidden_dim:, :]
    return (w1, b1, w2, b2, w3s, w3a, b3, w4, b4)


def reference_forward(x, action, params):
    (w1, b1, w2, b2, w3s, w3a, b3, w4, b4) = params
    h = jnp.tanh(x @ w1 + b1)
    a = jnp.tanh(action @ w2 + b2)
    cat = jnp.concatenate([h, a], axis=1)
    w3 = jnp.concatenate([w3s, w3a], axis=0)
    z = jnp.tanh(cat @ w3 + b3)
    return jnp.abs(z @ w4 + b4)


if __name__ == "__main__":
    # small shapes consistent with the module's constructor
    B, input_dim, input_dim_2 = 8, 16, 8
    hidden_dim, hidden_dim_2, output_dim = 32, 16, 4

    key = jax.random.PRNGKey(0)
    kx, ka, kp, kbig = jax.random.split(key, 4)
    x = jax.random.normal(kx, (B, input_dim), jnp.float32)
    action = jax.random.normal(ka, (B, input_dim_2), jnp.float32)
    params = init_params(kp, input_dim, input_dim_2,
                         hidden_dim, hidden_dim_2, output_dim)

    # small-batch correctness
    out = jax.block_until_ready(strategy_net_forward(x, action, params))
    ref = reference_forward(x, action, params)
    assert out.shape == (B, output_dim)
    np.testing.assert_allclose(np.asarray(out), np.asarray(ref),
                               rtol=1e-5, atol=1e-5)

    # larger batch exercising the big-tile, multi-step parallel-grid path
    B2 = 2048
    x2 = jax.random.normal(kbig, (B2, input_dim), jnp.float32)
    a2 = jax.random.normal(jax.random.fold_in(kbig, 1), (B2, input_dim_2),
                           jnp.float32)
    out2 = jax.block_until_ready(strategy_net_forward(x2, a2, params))
    ref2 = reference_forward(x2, a2, params)
    assert out2.shape == (B2, output_dim)
    np.testing.assert_allclose(np.asarray(out2), np.asarray(ref2),
                               rtol=1e-5, atol=1e-5)

    print("KERNEL_OK")
</pallas_src>

<mosaic_0001>
module attributes {stable_mosaic.version = 11 : i64} {
  func.func @strategy_net_kernel(%arg0: i32, %arg1: memref<8x16xf32, #tpu.memory_space<vmem>>, %arg2: memref<8x8xf32, #tpu.memory_space<vmem>>, %arg3: memref<16x32xf32, #tpu.memory_space<vmem>>, %arg4: memref<1x32xf32, #tpu.memory_space<vmem>>, %arg5: memref<8x16xf32, #tpu.memory_space<vmem>>, %arg6: memref<1x16xf32, #tpu.memory_space<vmem>>, %arg7: memref<32x32xf32, #tpu.memory_space<vmem>>, %arg8: memref<16x32xf32, #tpu.memory_space<vmem>>, %arg9: memref<1x32xf32, #tpu.memory_space<vmem>>, %arg10: memref<32x128xf32, #tpu.memory_space<vmem>>, %arg11: memref<1x128xf32, #tpu.memory_space<vmem>>, %arg12: memref<8x128xf32, #tpu.memory_space<vmem>>) attributes {dimension_semantics = [#tpu.dimension_semantics<parallel>], iteration_bounds = array<i64: 1>, scalar_prefetch = 0 : i64, scratch_operands = 0 : i64, tpu.core_type = #tpu.core_type<tc>, window_params = [{transform_indices = @transform_0, window_bounds = array<i64: 8, 16>}, {transform_indices = @transform_1, window_bounds = array<i64: 8, 8>}, {pipeline_mode = #tpu.pipeline_mode<synchronous>, transform_indices = @transform_2, window_bounds = array<i64: 16, 32>}, {pipeline_mode = #tpu.pipeline_mode<synchronous>, transform_indices = @transform_3, window_bounds = array<i64: 1, 32>}, {pipeline_mode = #tpu.pipeline_mode<synchronous>, transform_indices = @transform_4, window_bounds = array<i64: 8, 16>}, {pipeline_mode = #tpu.pipeline_mode<synchronous>, transform_indices = @transform_5, window_bounds = array<i64: 1, 16>}, {pipeline_mode = #tpu.pipeline_mode<synchronous>, transform_indices = @transform_6, window_bounds = array<i64: 32, 32>}, {pipeline_mode = #tpu.pipeline_mode<synchronous>, transform_indices = @transform_7, window_bounds = array<i64: 16, 32>}, {pipeline_mode = #tpu.pipeline_mode<synchronous>, transform_indices = @transform_8, window_bounds = array<i64: 1, 32>}, {pipeline_mode = #tpu.pipeline_mode<synchronous>, transform_indices = @transform_9, window_bounds = array<i64: 32, 128>}, {pipeline_mode = #tpu.pipeline_mode<synchronous>, transform_indices = @transform_10, window_bounds = array<i64: 1, 128>}, {transform_indices = @transform_11, window_bounds = array<i64: 8, 128>}]} {
    %c0 = arith.constant 0 : index
    %c0_0 = arith.constant 0 : index
    %0 = vector.load %arg1[%c0, %c0_0] : memref<8x16xf32, #tpu.memory_space<vmem>>, vector<8x16xf32>
    %c0_1 = arith.constant 0 : index
    %c0_2 = arith.constant 0 : index
    %1 = vector.load %arg3[%c0_1, %c0_2] : memref<16x32xf32, #tpu.memory_space<vmem>>, vector<16x32xf32>
    %cst = arith.constant dense<0.000000e+00> : vector<8x32xf32>
    %2 = tpu.matmul %0, %1, %cst {dimension_numbers = #tpu.dot_dimension_numbers<[1], [0], [0], [1], [0, 0, 1, 1], [], []>} : vector<8x16xf32>, vector<16x32xf32>, vector<8x32xf32> -> vector<8x32xf32>
    %c0_3 = arith.constant 0 : index
    %c0_4 = arith.constant 0 : index
    %3 = vector.load %arg4[%c0_3, %c0_4] : memref<1x32xf32, #tpu.memory_space<vmem>>, vector<1x32xf32>
    %4 = vector.broadcast %3 : vector<1x32xf32> to vector<8x32xf32>
    %5 = arith.addf %2, %4 : vector<8x32xf32>
    %6 = math.tanh %5 : vector<8x32xf32>
    %c0_5 = arith.constant 0 : index
    %c0_6 = arith.constant 0 : index
    %7 = vector.load %arg2[%c0_5, %c0_6] : memref<8x8xf32, #tpu.memory_space<vmem>>, vector<8x8xf32>
    %c0_7 = arith.constant 0 : index
    %c0_8 = arith.constant 0 : index
    %8 = vector.load %arg5[%c0_7, %c0_8] : memref<8x16xf32, #tpu.memory_space<vmem>>, vector<8x16xf32>
    %cst_9 = arith.constant dense<0.000000e+00> : vector<8x16xf32>
    %9 = tpu.matmul %7, %8, %cst_9 {dimension_numbers = #tpu.dot_dimension_numbers<[1], [0], [0], [1], [0, 0, 1, 1], [], []>} : vector<8x8xf32>, vector<8x16xf32>, vector<8x16xf32> -> vector<8x16xf32>
    %c0_10 = arith.constant 0 : index
    %c0_11 = arith.constant 0 : index
    %10 = vector.load %arg6[%c0_10, %c0_11] : memref<1x16xf32, #tpu.memory_space<vmem>>, vector<1x16xf32>
    %11 = vector.broadcast %10 : vector<1x16xf32> to vector<8x16xf32>
    %12 = arith.addf %9, %11 : vector<8x16xf32>
    %13 = math.tanh %12 : vector<8x16xf32>
    %c0_12 = arith.constant 0 : index
    %c0_13 = arith.constant 0 : index
    %14 = vector.load %arg7[%c0_12, %c0_13] : memref<32x32xf32, #tpu.memory_space<vmem>>, vector<32x32xf32>
    %cst_14 = arith.constant dense<0.000000e+00> : vector<8x32xf32>
    %15 = tpu.matmul %6, %14, %cst_14 {dimension_numbers = #tpu.dot_dimension_numbers<[1], [0], [0], [1], [0, 0, 1, 1], [], []>} : vector<8x32xf32>, vector<32x32xf32>, vector<8x32xf32> -> vector<8x32xf32>
    %c0_15 = arith.constant 0 : index
    %c0_16 = arith.constant 0 : index
    %16 = vector.load %arg8[%c0_15, %c0_16] : memref<16x32xf32, #tpu.memory_space<vmem>>, vector<16x32xf32>
    %cst_17 = arith.constant dense<0.000000e+00> : vector<8x32xf32>
    %17 = tpu.matmul %13, %16, %cst_17 {dimension_numbers = #tpu.dot_dimension_numbers<[1], [0], [0], [1], [0, 0, 1, 1], [], []>} : vector<8x16xf32>, vector<16x32xf32>, vector<8x32xf32> -> vector<8x32xf32>
    %18 = arith.addf %15, %17 : vector<8x32xf32>
    %c0_18 = arith.constant 0 : index
    %c0_19 = arith.constant 0 : index
    %19 = vector.load %arg9[%c0_18, %c0_19] : memref<1x32xf32, #tpu.memory_space<vmem>>, vector<1x32xf32>
    %20 = vector.broadcast %19 : vector<1x32xf32> to vector<8x32xf32>
    %21 = arith.addf %18, %20 : vector<8x32xf32>
    %22 = math.tanh %21 : vector<8x32xf32>
    %c0_20 = arith.constant 0 : index
    %c0_21 = arith.constant 0 : index
    %23 = vector.load %arg10[%c0_20, %c0_21] : memref<32x128xf32, #tpu.memory_space<vmem>>, vector<32x128xf32>
    %cst_22 = arith.constant dense<0.000000e+00> : vector<8x128xf32>
    %24 = tpu.matmul %22, %23, %cst_22 {dimension_numbers = #tpu.dot_dimension_numbers<[1], [0], [0], [1], [0, 0, 1, 1], [], []>} : vector<8x32xf32>, vector<32x128xf32>, vector<8x128xf32> -> vector<8x128xf32>
    %c0_23 = arith.constant 0 : index
    %c0_24 = arith.constant 0 : index
    %25 = vector.load %arg11[%c0_23, %c0_24] : memref<1x128xf32, #tpu.memory_space<vmem>>, vector<1x128xf32>
    %26 = vector.broadcast %25 : vector<1x128xf32> to vector<8x128xf32>
    %27 = arith.addf %24, %26 : vector<8x128xf32>
    %28 = math.absf %27 : vector<8x128xf32>
    %c0_25 = arith.constant 0 : index
    %c0_26 = arith.constant 0 : index
    %29 = vector.load %arg12[%c0_25, %c0_26] : memref<8x128xf32, #tpu.memory_space<vmem>>, vector<8x128xf32>
    tpu.vector_store %arg12[%c0_25, %c0_26], %28 {strides = array<i32>} : memref<8x128xf32, #tpu.memory_space<vmem>>, vector<8x128xf32>,
    return
  }
  func.func @transform_0(%arg0: i32) -> (i32, i32) {
    %c0_i32 = arith.constant 0 : i32
    %c0_i32_0 = arith.constant 0 : i32
    return %arg0, %c0_i32 : i32, i32
  }
  func.func @transform_1(%arg0: i32) -> (i32, i32) {
    %c0_i32 = arith.constant 0 : i32
    %c0_i32_0 = arith.constant 0 : i32
    return %arg0, %c0_i32 : i32, i32
  }
  func.func @transform_2(%arg0: i32) -> (i32, i32) {
    %c0_i32 = arith.constant 0 : i32
    %c0_i32_0 = arith.constant 0 : i32
    %c0_i32_1 = arith.constant 0 : i32
    return %c0_i32, %c0_i32_0 : i32, i32
  }
  func.func @transform_3(%arg0: i32) -> (i32, i32) {
    %c0_i32 = arith.constant 0 : i32
    %c0_i32_0 = arith.constant 0 : i32
    %c0_i32_1 = arith.constant 0 : i32
    return %c0_i32, %c0_i32_0 : i32, i32
  }
  func.func @transform_4(%arg0: i32) -> (i32, i32) {
    %c0_i32 = arith.constant 0 : i32
    %c0_i32_0 = arith.constant 0 : i32
    %c0_i32_1 = arith.constant 0 : i32
    return %c0_i32, %c0_i32_0 : i32, i32
  }
  func.func @transform_5(%arg0: i32) -> (i32, i32) {
    %c0_i32 = arith.constant 0 : i32
    %c0_i32_0 = arith.constant 0 : i32
    %c0_i32_1 = arith.constant 0 : i32
    return %c0_i32, %c0_i32_0 : i32, i32
  }
  func.func @transform_6(%arg0: i32) -> (i32, i32) {
    %c0_i32 = arith.constant 0 : i32
    %c0_i32_0 = arith.constant 0 : i32
    %c0_i32_1 = arith.constant 0 : i32
    return %c0_i32, %c0_i32_0 : i32, i32
  }
  func.func @transform_7(%arg0: i32) -> (i32, i32) {
    %c0_i32 = arith.constant 0 : i32
    %c0_i32_0 = arith.constant 0 : i32
    %c0_i32_1 = arith.constant 0 : i32
    return %c0_i32, %c0_i32_0 : i32, i32
  }
  func.func @transform_8(%arg0: i32) -> (i32, i32) {
    %c0_i32 = arith.constant 0 : i32
    %c0_i32_0 = arith.constant 0 : i32
    %c0_i32_1 = arith.constant 0 : i32
    return %c0_i32, %c0_i32_0 : i32, i32
  }
  func.func @transform_9(%arg0: i32) -> (i32, i32) {
    %c0_i32 = arith.constant 0 : i32
    %c0_i32_0 = arith.constant 0 : i32
    %c0_i32_1 = arith.constant 0 : i32
    return %c0_i32, %c0_i32_0 : i32, i32
  }
  func.func @transform_10(%arg0: i32) -> (i32, i32) {
    %c0_i32 = arith.constant 0 : i32
    %c0_i32_0 = arith.constant 0 : i32
    %c0_i32_1 = arith.constant 0 : i32
    return %c0_i32, %c0_i32_0 : i32, i32
  }
  func.func @transform_11(%arg0: i32) -> (i32, i32) {
    %c0_i32 = arith.constant 0 : i32
    %c0_i32_0 = arith.constant 0 : i32
    return %arg0, %c0_i32 : i32, i32
  }
}

</mosaic_0001>

<bundles_post_ra>
// kernel: tpu_custom_call.1
= control target key start
LH: loop header
LB: loop body
LE: loop exit
PB: predicated region body
PF: predicated region fallthrough
CT: control target
= control target key end

     0   :  { %16 = vsyncpa [#allocation3], 0  ;;  %s654_s0 = inlined_call_operand.hbm [shape: f32[8,16], index: 0, kind: input, shape index: {}]   ;;  %s655_s1 = inlined_call_operand.hbm [shape: f32[8,8], index: 1, kind: input, shape index: {}]   ;;  %s656_s2 = inlined_call_operand.hbm [shape: f32[16,32], index: 2, kind: input, shape index: {}]   ;;  %s657_s3 = inlined_call_operand.vmem [shape: f32[1,32], index: 3, kind: input, shape index: {}]   ;;  %s658_s4 = inlined_call_operand.hbm [shape: f32[8,16], index: 4, kind: input, shape index: {}]   ;;  %s659_s5 = inlined_call_operand.vmem [shape: f32[1,16], index: 5, kind: input, shape index: {}]   ;;  %s660_s6 = inlined_call_operand.hbm [shape: f32[32,32], index: 6, kind: input, shape index: {}]   ;;  %s661_s7 = inlined_call_operand.hbm [shape: f32[16,32], index: 7, kind: input, shape index: {}]   ;;  %s662_s8 = inlined_call_operand.vmem [shape: f32[1,32], index: 8, kind: input, shape index: {}]   ;;  %s663_s9 = inlined_call_operand.hbm [shape: f32[32,128], index: 9, kind: input, shape index: {}]   ;;  %s664_s10 = inlined_call_operand.vmem [shape: f32[1,128], index: 10, kind: input, shape index: {}]   ;;  %s665_s11 = inlined_call_operand.hbm [shape: f32[8,128], index: 11, kind: output, shape index: {}]  }
   0x1   :  { %17 = vsyncpa [#allocation6], 0 }
   0x2   :  { %18 = vsyncpa [#allocation9], 0 }
   0x3   :  { %19 = vsyncpa [#allocation12], 0  ;;  %s37_s19 = sshll.u32 %s655_s1, 4  ;;  %s38_s19 = int_to_ptr.hbm [resolvable:$true] %s37_s19 }
   0x4   :  { %20 = vsyncpa [#allocation4], 0  ;;  %s544_s20 = smov [#allocation5]   ;;  %s63_s24 = sshll.u32 %s658_s4, 4  ;;  %s64_s24 = int_to_ptr.hbm [resolvable:$true] %s63_s24 }
   0x5   :  { %s39_s21 = sshll.u32 %s544_s20, 4  ;;  %s545_s25 = smov [#allocation8]   ;;  %s40_s21 = int_to_ptr.vmem [resolvable:$true] %s39_s21 }
   0x6   :  { %42 = dma.hbm_to_vmem [thread:$0]  %s38_s19, 128, %s40_s21, [#allocation6]  }
   0x7   :  { %s65_s26 = sshll.u32 %s545_s25, 4  ;;  %s88_s29 = sshll.u32 %s661_s7, 4  ;;  %s66_s26 = int_to_ptr.vmem [resolvable:$true] %s65_s26  ;;  %s89_s29 = int_to_ptr.hbm [resolvable:$true] %s88_s29 }
   0x8   :  { %68 = dma.hbm_to_vmem [thread:$0]  %s64_s24, 128, %s66_s26, [#allocation9]  }
   0x9   :  { %s546_s1 = smov [#allocation11]   ;;  %s26_s14 = sshll.u32 %s654_s0, 4  ;;  %s27_s14 = int_to_ptr.hbm [resolvable:$true] %s26_s14 }
   0xa   :  { %s90_s30 = sshll.u32 %s546_s1, 4  ;;  %s547_s15 = smov 128   ;;  %s91_s30 = int_to_ptr.vmem [resolvable:$true] %s90_s30 }
   0xb   :  { %s548_s4 = smov 8   ;;  %s549_s16 = smov [#allocation2]  }
   0xc   :  { %96 = dma.hbm_to_vmem [thread:$0]  %s89_s29, 256, %s91_s30, [#allocation12], %s547_s15, %s547_s15, %s548_s4  }
   0xd   :  { %s28_s17 = sshll.u32 %s549_s16, 4  ;;  %s47_s20 = sshll.u32 %s656_s2, 4  ;;  %s29_s17 = int_to_ptr.vmem [resolvable:$true] %s28_s17  ;;  %s48_s20 = int_to_ptr.hbm [resolvable:$true] %s47_s20 }
   0xe   :  { %31 = dma.hbm_to_vmem [thread:$0]  %s27_s14, 128, %s29_s17, [#allocation3]  }
   0xf   :  { %s75_s22 = sshll.u32 %s660_s6, 4  ;;  %s550_s23 = smov [#allocation7]   ;;  %s76_s22 = int_to_ptr.hbm [resolvable:$true] %s75_s22 }
  0x10   :  { %s49_s24 = sshll.u32 %s550_s23, 4  ;;  %s551_s0 = smov [#allocation10]   ;;  %s50_s24 = int_to_ptr.vmem [resolvable:$true] %s49_s24 }
  0x11   :  { %55 = dma.hbm_to_vmem [thread:$0]  %s48_s20, 256, %s50_s24, [#allocation6], %s547_s15, %s547_s15, %s548_s4  }
  0x12   :  { %s77_s25 = sshll.u32 %s551_s0, 4  ;;  %s103_s28 = sshll.u32 %s663_s9, 4  ;;  %s78_s25 = int_to_ptr.vmem [resolvable:$true] %s77_s25  ;;  %s104_s28 = int_to_ptr.hbm [resolvable:$true] %s103_s28 }
  0x13   :  { %83 = dma.hbm_to_vmem [thread:$0]  %s76_s22, 512, %s78_s25, [#allocation9], %s547_s15, %s547_s15, %s548_s4  }
  0x14   :  { %s552_s2 = smov [#allocation13]  }
  0x15   :  { %s105_s29 = sshll.u32 %s552_s2, 4  ;;  %s106_s29 = int_to_ptr.vmem [resolvable:$true] %s105_s29 }
  0x16   :  { %111 = dma.hbm_to_vmem [thread:$0]  %s104_s28, 512, %s106_s29, [#allocation12], %s547_s15, %s547_s15, %s548_s4  }
  0x17   :  { %534 = dma.done.wait [#allocation3], 128  }
  0x18   :  { %535 = vsyncadd [#allocation3], 4294967168 }
  0x19   :  { %536 = dma.done.wait [#allocation6], 384  }
  0x1a   :  { %537 = vsyncadd [#allocation6], 4294966912 }
  0x1b   :  { %538 = dma.done.wait [#allocation9], 640  }
  0x1c   :  { %539 = vsyncadd [#allocation9], 4294966656 }
  0x1d   :  { %540 = dma.done.wait [#allocation12], 768  }
  0x1e   :  { %541 = vsyncadd [#allocation12], 4294966528  ;;  %vm180_vm0 = vcmask 64512   ;;  %v144_v0 = vld [vmem:[#allocation7 + $0x8] sm:$0xff]  ;;  %v143_v1 = vld [vmem:[#allocation7] sm:$0xff]  ;;  %vm149_vm1 = vcmask 130048  }
  0x1f   :  { %v175_v2 = vld [vmem:[#allocation8] sm:$0xff]  ;;  %167 = vmatpush.msra.mxu0 %v144_v0  ;;  %v174_v4 = vld [vmem:[#allocation5] sm:$0xff]  ;;  %v207_v6 = vld [vmem:[#allocation10 + $0x10] sm:$0xff]  ;;  %vm234_vm2 = vcmask 261120   ;;  %s553_s14 = smov [#allocation14]   ;;  %s304_s17 = sshll.u32 %s665_s11, 4  ;;  %s305_s17 = int_to_ptr.hbm [resolvable:$true] %s304_s17 }
  0x20   :  { %199 = vmatpush.msra.mxu1 %v175_v2  ;;  %v142_v3 = vld [vmem:[#allocation2] sm:$0xff]  ;;  %v210_v7 = vld [vmem:[#allocation11 + $0x8] sm:$0xff]  ;;  %v209_v9 = vld [vmem:[#allocation11] sm:$0xff]  ;;  %s302_s15 = sshll.u32 %s553_s14, 4  ;;  %s303_s15 = int_to_ptr.vmem [resolvable:$true] %s302_s15 }
  0x21   :  { %318 = vmatmul.msk.f32.vlgmr.msra.gmra.mxu1 %vm180_vm0, %v174_v4  ;;  %168 = vmatpush.msra.mxu0 %v143_v1  ;;  %v208_v5 = vld [vmem:[#allocation10 + $0x18] sm:$0xff]  ;;  %v206_v8 = vld [vmem:[#allocation10 + $0x8] sm:$0xff]  ;;  %v205_v10 = vld [vmem:[#allocation10] sm:$0xff] }
  0x22   :  { %317 = vmatmul.msk.f32.vlgmr.msra.gmra.mxu0 %vm149_vm1, %v142_v3  ;;  %250 = vmatpush.msra.mxu3 %v208_v5  ;;  %v333_v11 = vld [vmem:[%s659_s5] ss:$0 sm:$0xff]  ;;  %v267_v19 = vld [vmem:[#allocation13 + $0x18] sm:$0xff]  ;;  %v266_v20 = vld [vmem:[#allocation13 + $0x10] sm:$0xff] }
  0x23   :  { %228 = vmatpush.msra.mxu2 %v210_v7  ;;  %v332_v12 = vld [vmem:[%s657_s3] ss:$0 sm:$0xff]  ;;  %287 = vmatpush.msrb.mxu1 %v267_v19  ;;  %v264_v22 = vld [vmem:[#allocation13] sm:$0xff] }
  0x24   :  { %251 = vmatpush.msra.mxu3 %v207_v6  ;;  %v265_v21 = vld [vmem:[#allocation13 + $0x8] sm:$0xff] }
  0x25   :  { %229 = vmatpush.msra.mxu2 %v209_v9  ;;  %288 = vmatpush.msrb.mxu1 %v266_v20  ;;  %v334_v24 = vld [vmem:[%s662_s8] ss:$0 sm:$0xff] }
  0x26   :  { %252 = vmatpush.msra.mxu3 %v206_v8  ;;  %v335_v29 = vld [vmem:[%s664_s10] ss:$0 sm:$0xff] }
  0x27   :  { %289 = vmatpush.msrb.mxu1 %v265_v21 }
  0x28   :  { %253 = vmatpush.msra.mxu3 %v205_v10 }
  0x29   :  { %290 = vmatpush.msrb.mxu1 %v264_v22 }
  0x9e   :  { %v201_v13 = vpop.f32.mrf.mxu1 }
  0x9f   :  { %v202_v14 = vadd.f32 %v333_v11, %v201_v13  ;;  %v170_v15 = vpop.f32.mrf.mxu0 }
  0xa0   :  { %v171_v16 = vadd.f32 %v332_v12, %v170_v15 }
  0xa1   :  { %336 = vtanh.f32 %v202_v14 }
  0xa2   :  { %338 = vtanh.f32 %v171_v16 }
  0xa7   :  { %v337_v17 = vpop.eup %336 }
  0xa8   :  { %319 = vmatmul.msk.f32.vlgmr.msra.gmra.mxu2 %vm149_vm1, %v337_v17  ;;  %v339_v18 = vpop.eup %338 }
  0xa9   :  { %320 = vmatmul.msk.f32.vlgmr.msra.gmra.mxu3 %vm234_vm2, %v339_v18 }
 0x12b   :  { %v231_v23 = vpop.f32.mrf.mxu2 }
 0x12c   :  { %v255_v25 = vpop.f32.mrf.mxu3 }
 0x12d   :  { %v256_v26 = vadd.f32 %v255_v25, %v231_v23 }
 0x12f   :  { %v262_v27 = vadd.f32 %v334_v24, %v256_v26 }
 0x131   :  { %340 = vtanh.f32 %v262_v27 }
 0x137   :  { %v341_v28 = vpop.eup %340 }
 0x138   :  { %321 = vmatmul.msk.f32.vlgmr.msrb.gmra.mxu1 %vm234_vm2, %v341_v28 }
 0x1b5   :  { %v292_v30 = vpop.f32.mrf.mxu1 }
 0x1b6   :  { %v293_v31 = vadd.f32 %v335_v29, %v292_v30 }
 0x1b8   :  { %v295_v32 = vand.u32 2147483647, %v293_v31 }
 0x1ba   :  { %296 = vst [vmem:[#allocation14] sm:$0xff] %v295_v32 }
 0x1bb   :  { %307 = dma.vmem_to_hbm [thread:$0]  %s303_s15, 128, %s305_s17, [#allocation4]  }
 0x1bc   :  { %542 = dma.done.wait [#allocation4], 128  }
 0x1bd   :  { %543 = vsyncadd [#allocation4], 4294967168 }
 0x1be   :  { %312 = vsyncpa [#allocation3], 1 }
 0x1bf   :  { %313 = vsyncpa [#allocation6], 1 }
 0x1c0   :  { %314 = vsyncpa [#allocation9], 1 }
 0x1c1   :  { %315 = vsyncpa [#allocation12], 1 }
 0x1c2   :  { %316 = vsyncpa [#allocation4], 1 }

</bundles_post_ra>
